<compile_context>
chip_gen: v6e
topology: v6e:2x2x1
jax: 0.10.0
libtpu: 0.0.40
codegen_flags: <defaults>
</compile_context>

<pallas_src>
import functools

import jax
import jax.numpy as jnp
import numpy as np
from jax import lax
from jax.experimental import pallas as pl
from jax.experimental.pallas import tpu as pltpu


# --------------------------------------------------------------------------
# Pallas kernel: one grid step processes Bt batch elements end-to-end.
# --------------------------------------------------------------------------
def _bam_kernel(x_ref, wf_ref, wca2_ref, w2s_ref, pk_ref, mask_ref, o_ref, *,
                M, Bt, H, W, dilation):
    HW = H * W
    twoM = 2 * M

    # Tiny per-channel params packed into one (2M, 8) tile (single DMA).
    s1 = pk_ref[:, 0:1]            # (2M, 1)  BN1 scale  (rows >= M are 0)
    t1 = pk_ref[:, 1:2]            # (2M, 1)  BN1 shift  (rows >= M are 0)
    s2 = pk_ref[0:M, 2:3]          # (M, 1)   BN2 scale
    t2 = pk_ref[0:M, 3:4]          # (M, 1)   BN2 shift
    w3 = pk_ref[0:M, 4:5]          # (M, 1)   final 1x1 conv weight
    b3 = pk_ref[0:1, 5:6]          # (1, 1)   final 1x1 conv bias

    wf = wf_ref[...]               # (2M, C)   bf16: [w_sp1^T ; w_ca1^T]
    w2s = w2s_ref[...]             # (M, 9*2M) bf16: stacked dilated-conv taps
    wca2 = wca2_ref[...]           # (C, M)    f32

    # Static unrolled loop over the batch elements of this block.
    for b in range(Bt):
        x = x_ref[b]                                        # (C, HW) f32

        # Fused first 1x1 convs (spatial + channel branch share one MXU dot).
        fused = jnp.dot(wf, x.astype(jnp.bfloat16),
                        preferred_element_type=jnp.float32)  # (2M, HW) f32

        # ---- channel attention: mean commutes with the matmul ----
        row_mean = jnp.mean(fused, axis=1, keepdims=True)    # (2M, 1)
        h_ca = jnp.maximum(row_mean[M:twoM, :], 0.0)         # (M, 1)
        ch = jnp.dot(wca2, h_ca,
                     preferred_element_type=jnp.float32)     # (C, 1)

        # ---- spatial attention ----
        # 1x1 conv + folded BN1 + ReLU; rows >= M have scale/shift 0 -> exact 0.
        h1 = jnp.maximum(fused * s1 + t1, 0.0)               # (2M, HW)

        # Dilated 3x3 conv (padding == dilation) as 8 lane rolls + precomputed
        # boundary masks, contracted in one small bf16 MXU dot.
        slabs = []
        for ky in range(3):
            for kx in range(3):
                k = ky * 3 + kx
                if ky == 1 and kx == 1:
                    slabs.append(h1)                          # center tap: no roll/mask
                    continue
                s = ((ky - 1) * W + (kx - 1)) * dilation      # flat tap offset
                rolled = pltpu.roll(h1, shift=(-s) % HW, axis=1)
                slabs.append(rolled * mask_ref[k:k + 1, :])
        stacked = jnp.concatenate(slabs, axis=0).astype(jnp.bfloat16)  # (9*2M, HW)
        h2 = jnp.dot(w2s, stacked,
                     preferred_element_type=jnp.float32)      # (M, HW)
        h2 = jnp.maximum(h2 * s2 + t2, 0.0)                   # BN2 + ReLU

        # Final 1x1 conv to one spatial map: sublane broadcast + sublane reduce.
        sp = jnp.sum(h2 * w3, axis=0, keepdims=True) + b3     # (1, HW)

        # ---- combine: sigmoid(ch + sp) broadcast to (C, HW), gate input ----
        att = jax.nn.sigmoid(ch + sp)                         # (C, HW)
        o_ref[b] = x * att


# --------------------------------------------------------------------------
# Wrapper helpers
# --------------------------------------------------------------------------
def _build_tap_masks(H, W, dilation):
    """Boundary masks for the 9 dilated-conv taps, hoisted out of the kernel."""
    HW = H * W
    pos = np.arange(HW)
    hh = pos // W
    ww = pos % W
    masks = np.ones((9, HW), np.float32)
    for ky in range(3):
        for kx in range(3):
            dy = (ky - 1) * dilation
            dx = (kx - 1) * dilation
            ok = ((hh + dy >= 0) & (hh + dy < H)
                  & (ww + dx >= 0) & (ww + dx < W))
            masks[ky * 3 + kx] = ok.astype(np.float32)
    return jnp.asarray(masks)


def _pick_bt(N, elem_bytes, target_bytes=512 * 1024):
    """Batch elements per grid step: ~512 KiB blocks, >=2 steps for v7x 2-TC."""
    bt = int(max(1, min(N, target_bytes // max(elem_bytes, 1))))
    if N >= 2:
        bt = min(bt, max(1, N // 2))
    while N % bt != 0:
        bt -= 1
    return bt


def bam_pallas(x_nchw, kernel_params, *, dilation=4, batch_tile=None):
    N, C, H, W = x_nchw.shape
    HW = H * W
    # The roll-based dilated conv relies on H, W being compile-time constants.
    assert isinstance(H, int) and isinstance(W, int) and H > 0 and W > 0

    wf, wca2_t, w2s, pk = kernel_params
    twoM = wf.shape[0]
    M = twoM // 2

    Bt = batch_tile if batch_tile is not None else _pick_bt(N, C * HW * 4)
    assert N % Bt == 0

    x = x_nchw.reshape(N, C, HW).astype(jnp.float32)   # free reshape of NCHW
    masks = _build_tap_masks(H, W, dilation)

    kernel = functools.partial(_bam_kernel, M=M, Bt=Bt, H=H, W=W,
                               dilation=dilation)

    def full_spec(shape):
        nd = len(shape)
        return pl.BlockSpec(shape, lambda n, _nd=nd: (0,) * _nd)

    out = pl.pallas_call(
        kernel,
        out_shape=jax.ShapeDtypeStruct((N, C, HW), jnp.float32),
        grid=(N // Bt,),
        in_specs=[
            pl.BlockSpec((Bt, C, HW), lambda n: (n, 0, 0)),   # x (lane-dense)
            full_spec((twoM, C)),                             # fused [w_sp1^T; w_ca1^T]
            full_spec((C, M)),                                # w_ca2^T
            full_spec((M, 9 * twoM)),                         # stacked dilated-conv weight
            full_spec((twoM, 8)),                             # packed scalars
            full_spec((9, HW)),                               # precomputed tap masks
        ],
        out_specs=pl.BlockSpec((Bt, C, HW), lambda n: (n, 0, 0)),
        compiler_params=pltpu.CompilerParams(dimension_semantics=("parallel",)),
    )(x, wf, wca2_t, w2s, pk, masks)

    return out.reshape(N, C, H, W)


# --------------------------------------------------------------------------
# Deterministic parameter init (synthetic weights, shapes from BAM.__init__)
# --------------------------------------------------------------------------
def init_params(key, C, M, eps=1e-5):
    ks = jax.random.split(key, 16)

    def rnd(k, shape, scale=0.1):
        return (scale * jax.random.normal(k, shape)).astype(jnp.float32)

    raw = dict(
        w_ca1=rnd(ks[0], (C, M)),          # channel attn conv1 (C -> M), no bias
        w_ca2=rnd(ks[1], (M, C)),          # channel attn conv2 (M -> C), no bias
        w_sp1=rnd(ks[2], (C, M)),          # spatial conv1 1x1
        b_sp1=rnd(ks[3], (M,)),
        g1=1.0 + rnd(ks[4], (M,)),         # BN1 gamma
        beta1=rnd(ks[5], (M,)),            # BN1 beta
        mean1=rnd(ks[6], (M,)),            # BN1 running mean
        var1=1.0 + jnp.abs(rnd(ks[7], (M,))),   # BN1 running var
        w_sp2=rnd(ks[8], (9, M, M)),       # 3x3 dilated conv, (tap, in, out)
        b_sp2=rnd(ks[9], (M,)),
        g2=1.0 + rnd(ks[10], (M,)),
        beta2=rnd(ks[11], (M,)),
        mean2=rnd(ks[12], (M,)),
        var2=1.0 + jnp.abs(rnd(ks[13], (M,))),
        w_sp3=rnd(ks[14], (M, 1)),         # spatial conv3 1x1 (M -> 1)
        b_sp3=rnd(ks[15], (1, 1)),
    )

    # Fold conv bias + eval-mode BatchNorm into per-channel scale/shift.
    s1 = raw['g1'] / jnp.sqrt(raw['var1'] + eps)
    t1 = (raw['b_sp1'] - raw['mean1']) * s1 + raw['beta1']
    s2 = raw['g2'] / jnp.sqrt(raw['var2'] + eps)
    t2 = (raw['b_sp2'] - raw['mean2']) * s2 + raw['beta2']

    zM = jnp.zeros((M,), jnp.float32)

    # Fused first-conv weight: [w_sp1^T ; w_ca1^T] -> (2M, C), bf16 for the MXU.
    wf = jnp.concatenate([jnp.transpose(raw['w_sp1']),
                          jnp.transpose(raw['w_ca1'])], axis=0).astype(jnp.bfloat16)

    wca2_t = jnp.transpose(raw['w_ca2'])   # (C, M) f32

    # Stacked dilated-conv weight (M_out, 9*2M): column k*2M+i = w_sp2[k, i, o],
    # zero for the padded rows i >= M.
    w2_t = jnp.transpose(raw['w_sp2'], (0, 2, 1))          # (9, M_out, M_in)
    w2_pad = jnp.pad(w2_t, ((0, 0), (0, 0), (0, M)))       # (9, M_out, 2M)
    w2s = jnp.transpose(w2_pad, (1, 0, 2)).reshape(M, 9 * 2 * M).astype(jnp.bfloat16)

    # Packed per-channel scalars (one small tile / one DMA).
    pk = jnp.zeros((2 * M, 8), jnp.float32)
    pk = pk.at[:, 0].set(jnp.concatenate([s1, zM]))
    pk = pk.at[:, 1].set(jnp.concatenate([t1, zM]))
    pk = pk.at[0:M, 2].set(s2)
    pk = pk.at[0:M, 3].set(t2)
    pk = pk.at[0:M, 4].set(raw['w_sp3'][:, 0])
    pk = pk.at[0, 5].set(raw['b_sp3'][0, 0])

    return raw, (wf, wca2_t, w2s, pk)


# --------------------------------------------------------------------------
# Pure-JAX reference (uses lax.conv_general_dilated for the dilated conv)
# --------------------------------------------------------------------------
def bam_reference(x_nchw, raw, dilation, eps=1e-5):
    hi = lax.Precision.HIGHEST
    x = jnp.transpose(x_nchw, (0, 2, 3, 1)).astype(jnp.float32)   # NHWC
    M = raw['w_ca1'].shape[1]

    # channel attention
    xm = jnp.mean(x, axis=(1, 2))                                 # (N, C)
    h = jnp.maximum(jnp.einsum('nc,cm->nm', xm, raw['w_ca1'], precision=hi), 0.0)
    ch = jnp.einsum('nm,mc->nc', h, raw['w_ca2'], precision=hi)   # (N, C)

    # spatial attention
    h1 = jnp.einsum('nhwc,cm->nhwm', x, raw['w_sp1'], precision=hi) + raw['b_sp1']
    h1 = (h1 - raw['mean1']) / jnp.sqrt(raw['var1'] + eps) * raw['g1'] + raw['beta1']
    h1 = jnp.maximum(h1, 0.0)

    w_hwio = raw['w_sp2'].reshape(3, 3, M, M)
    h2 = lax.conv_general_dilated(
        h1, w_hwio, window_strides=(1, 1),
        padding=((dilation, dilation), (dilation, dilation)),
        rhs_dilation=(dilation, dilation),
        dimension_numbers=('NHWC', 'HWIO', 'NHWC'),
        precision=hi) + raw['b_sp2']
    h2 = (h2 - raw['mean2']) / jnp.sqrt(raw['var2'] + eps) * raw['g2'] + raw['beta2']
    h2 = jnp.maximum(h2, 0.0)

    sp = jnp.einsum('nhwm,mo->nhwo', h2, raw['w_sp3'], precision=hi) + raw['b_sp3'][0, 0]

    att = jax.nn.sigmoid(ch[:, None, None, :] + sp)               # (N,H,W,C)
    out = x * att
    return jnp.transpose(out, (0, 3, 1, 2))                       # NCHW


if __name__ == "__main__":
    # small shapes consistent with BAM: reduction=16 needs C >= 16
    N, C, H, W = 2, 64, 16, 16
    reduction, dilation = 16, 4
    M = C // reduction

    key = jax.random.PRNGKey(0)
    kx, kp = jax.random.split(key)
    x = jax.random.normal(kx, (N, C, H, W), dtype=jnp.float32)

    raw, kernel_params = init_params(kp, C, M)

    out = bam_pallas(x, kernel_params, dilation=dilation)
    out = jax.block_until_ready(out)

    ref = bam_reference(x, raw, dilation)
    # bf16 MXU operands (f32 accumulation) -> relax tolerance vs HIGHEST reference.
    np.testing.assert_allclose(np.asarray(out), np.asarray(ref), atol=1e-2, rtol=1e-2)

    print("KERNEL_OK")
</pallas_src>

<mosaic_0001>
module attributes {stable_mosaic.version = 11 : i64} {
  func.func @_bam_kernel(%arg0: i32, %arg1: memref<1x64x256xf32, #tpu.memory_space<vmem>>, %arg2: memref<8x64xbf16, #tpu.memory_space<vmem>>, %arg3: memref<64x4xf32, #tpu.memory_space<vmem>>, %arg4: memref<4x72xbf16, #tpu.memory_space<vmem>>, %arg5: memref<8x8xf32, #tpu.memory_space<vmem>>, %arg6: memref<9x256xf32, #tpu.memory_space<vmem>>, %arg7: memref<1x64x256xf32, #tpu.memory_space<vmem>>) attributes {dimension_semantics = [#tpu.dimension_semantics<parallel>], iteration_bounds = array<i64: 2>, scalar_prefetch = 0 : i64, scratch_operands = 0 : i64, tpu.core_type = #tpu.core_type<tc>, window_params = [{transform_indices = @transform_0, window_bounds = array<i64: 1, 64, 256>}, {pipeline_mode = #tpu.pipeline_mode<synchronous>, transform_indices = @transform_1, window_bounds = array<i64: 8, 64>}, {pipeline_mode = #tpu.pipeline_mode<synchronous>, transform_indices = @transform_2, window_bounds = array<i64: 64, 4>}, {pipeline_mode = #tpu.pipeline_mode<synchronous>, transform_indices = @transform_3, window_bounds = array<i64: 4, 72>}, {pipeline_mode = #tpu.pipeline_mode<synchronous>, transform_indices = @transform_4, window_bounds = array<i64: 8, 8>}, {pipeline_mode = #tpu.pipeline_mode<synchronous>, transform_indices = @transform_5, window_bounds = array<i64: 9, 256>}, {transform_indices = @transform_6, window_bounds = array<i64: 1, 64, 256>}]} {
    %c0 = arith.constant 0 : index
    %c0_0 = arith.constant 0 : index
    %0 = vector.load %arg5[%c0, %c0_0] : memref<8x8xf32, #tpu.memory_space<vmem>>, vector<8x1xf32>
    %c0_1 = arith.constant 0 : index
    %c1 = arith.constant 1 : index
    %1 = vector.load %arg5[%c0_1, %c1] : memref<8x8xf32, #tpu.memory_space<vmem>>, vector<8x1xf32>
    %c0_2 = arith.constant 0 : index
    %c2 = arith.constant 2 : index
    %2 = vector.load %arg5[%c0_2, %c2] : memref<8x8xf32, #tpu.memory_space<vmem>>, vector<4x1xf32>
    %c0_3 = arith.constant 0 : index
    %c3 = arith.constant 3 : index
    %3 = vector.load %arg5[%c0_3, %c3] : memref<8x8xf32, #tpu.memory_space<vmem>>, vector<4x1xf32>
    %c0_4 = arith.constant 0 : index
    %c4 = arith.constant 4 : index
    %4 = vector.load %arg5[%c0_4, %c4] : memref<8x8xf32, #tpu.memory_space<vmem>>, vector<4x1xf32>
    %c0_5 = arith.constant 0 : index
    %c5 = arith.constant 5 : index
    %5 = vector.load %arg5[%c0_5, %c5] : memref<8x8xf32, #tpu.memory_space<vmem>>, vector<1x1xf32>
    %c0_6 = arith.constant 0 : index
    %c0_7 = arith.constant 0 : index
    %6 = vector.load %arg2[%c0_6, %c0_7] : memref<8x64xbf16, #tpu.memory_space<vmem>>, vector<8x64xbf16>
    %c0_8 = arith.constant 0 : index
    %c0_9 = arith.constant 0 : index
    %7 = vector.load %arg4[%c0_8, %c0_9] : memref<4x72xbf16, #tpu.memory_space<vmem>>, vector<4x72xbf16>
    %c0_10 = arith.constant 0 : index
    %c0_11 = arith.constant 0 : index
    %8 = vector.load %arg3[%c0_10, %c0_11] : memref<64x4xf32, #tpu.memory_space<vmem>>, vector<64x4xf32>
    %c0_12 = arith.constant 0 : index
    %c0_13 = arith.constant 0 : index
    %c0_14 = arith.constant 0 : index
    %9 = vector.load %arg1[%c0_12, %c0_13, %c0_14] : memref<1x64x256xf32, #tpu.memory_space<vmem>>, vector<1x64x256xf32>
    %10 = vector.shape_cast %9 : vector<1x64x256xf32> to vector<64x256xf32>
    %11 = arith.truncf %10 : vector<64x256xf32> to vector<64x256xbf16>
    %cst = arith.constant dense<0.000000e+00> : vector<8x256xf32>
    %12 = tpu.matmul %6, %11, %cst {dimension_numbers = #tpu.dot_dimension_numbers<[1], [0], [0], [1], [0, 0, 1, 1], [], []>} : vector<8x64xbf16>, vector<64x256xbf16>, vector<8x256xf32> -> vector<8x256xf32>
    %cst_15 = arith.constant dense<0.000000e+00> : vector<8xf32>
    %13 = vector.multi_reduction <add>, %12, %cst_15 [1] : vector<8x256xf32> to vector<8xf32>
    %14 = vector.shape_cast %13 : vector<8xf32> to vector<8x1xf32>
    %cst_16 = arith.constant 2.560000e+02 : f32
    %15 = vector.broadcast %cst_16 : f32 to vector<8x1xf32>
    %16 = arith.divf %14, %15 : vector<8x1xf32>
    %17 = vector.extract_strided_slice %16 {offsets = [4, 0], sizes = [4, 1], strides = [1, 1]} : vector<8x1xf32> to vector<4x1xf32>
    %cst_17 = arith.constant 0.000000e+00 : f32
    %18 = vector.broadcast %cst_17 : f32 to vector<4x1xf32>
    %19 = arith.maximumf %17, %18 : vector<4x1xf32>
    %cst_18 = arith.constant dense<0.000000e+00> : vector<64x1xf32>
    %20 = tpu.matmul %8, %19, %cst_18 {dimension_numbers = #tpu.dot_dimension_numbers<[1], [0], [0], [1], [0, 0, 1, 1], [], []>} : vector<64x4xf32>, vector<4x1xf32>, vector<64x1xf32> -> vector<64x1xf32>
    %21 = vector.broadcast %0 : vector<8x1xf32> to vector<8x256xf32>
    %22 = arith.mulf %12, %21 : vector<8x256xf32>
    %23 = vector.broadcast %1 : vector<8x1xf32> to vector<8x256xf32>
    %24 = arith.addf %22, %23 : vector<8x256xf32>
    %cst_19 = arith.constant 0.000000e+00 : f32
    %25 = vector.broadcast %cst_19 : f32 to vector<8x256xf32>
    %26 = arith.maximumf %24, %25 : vector<8x256xf32>
    %c68_i32 = arith.constant 68 : i32
    %27 = tpu.dynamic_rotate %26 by %c68_i32 dim 1 : vector<8x256xf32>, i32 -> vector<8x256xf32>
    %c0_20 = arith.constant 0 : index
    %c0_21 = arith.constant 0 : index
    %28 = vector.load %arg6[%c0_20, %c0_21] : memref<9x256xf32, #tpu.memory_space<vmem>>, vector<1x256xf32>
    %29 = vector.broadcast %28 : vector<1x256xf32> to vector<8x256xf32>
    %30 = arith.mulf %27, %29 : vector<8x256xf32>
    %c64_i32 = arith.constant 64 : i32
    %31 = tpu.dynamic_rotate %26 by %c64_i32 dim 1 : vector<8x256xf32>, i32 -> vector<8x256xf32>
    %c1_22 = arith.constant 1 : index
    %c0_23 = arith.constant 0 : index
    %32 = vector.load %arg6[%c1_22, %c0_23] : memref<9x256xf32, #tpu.memory_space<vmem>>, vector<1x256xf32>
    %33 = vector.broadcast %32 : vector<1x256xf32> to vector<8x256xf32>
    %34 = arith.mulf %31, %33 : vector<8x256xf32>
    %c60_i32 = arith.constant 60 : i32
    %35 = tpu.dynamic_rotate %26 by %c60_i32 dim 1 : vector<8x256xf32>, i32 -> vector<8x256xf32>
    %c2_24 = arith.constant 2 : index
    %c0_25 = arith.constant 0 : index
    %36 = vector.load %arg6[%c2_24, %c0_25] : memref<9x256xf32, #tpu.memory_space<vmem>>, vector<1x256xf32>
    %37 = vector.broadcast %36 : vector<1x256xf32> to vector<8x256xf32>
    %38 = arith.mulf %35, %37 : vector<8x256xf32>
    %c4_i32 = arith.constant 4 : i32
    %39 = tpu.dynamic_rotate %26 by %c4_i32 dim 1 : vector<8x256xf32>, i32 -> vector<8x256xf32>
    %c3_26 = arith.constant 3 : index
    %c0_27 = arith.constant 0 : index
    %40 = vector.load %arg6[%c3_26, %c0_27] : memref<9x256xf32, #tpu.memory_space<vmem>>, vector<1x256xf32>
    %41 = vector.broadcast %40 : vector<1x256xf32> to vector<8x256xf32>
    %42 = arith.mulf %39, %41 : vector<8x256xf32>
    %c252_i32 = arith.constant 252 : i32
    %43 = tpu.dynamic_rotate %26 by %c252_i32 dim 1 : vector<8x256xf32>, i32 -> vector<8x256xf32>
    %c5_28 = arith.constant 5 : index
    %c0_29 = arith.constant 0 : index
    %44 = vector.load %arg6[%c5_28, %c0_29] : memref<9x256xf32, #tpu.memory_space<vmem>>, vector<1x256xf32>
    %45 = vector.broadcast %44 : vector<1x256xf32> to vector<8x256xf32>
    %46 = arith.mulf %43, %45 : vector<8x256xf32>
    %c196_i32 = arith.constant 196 : i32
    %47 = tpu.dynamic_rotate %26 by %c196_i32 dim 1 : vector<8x256xf32>, i32 -> vector<8x256xf32>
    %c6 = arith.constant 6 : index
    %c0_30 = arith.constant 0 : index
    %48 = vector.load %arg6[%c6, %c0_30] : memref<9x256xf32, #tpu.memory_space<vmem>>, vector<1x256xf32>
    %49 = vector.broadcast %48 : vector<1x256xf32> to vector<8x256xf32>
    %50 = arith.mulf %47, %49 : vector<8x256xf32>
    %c192_i32 = arith.constant 192 : i32
    %51 = tpu.dynamic_rotate %26 by %c192_i32 dim 1 : vector<8x256xf32>, i32 -> vector<8x256xf32>
    %c7 = arith.constant 7 : index
    %c0_31 = arith.constant 0 : index
    %52 = vector.load %arg6[%c7, %c0_31] : memref<9x256xf32, #tpu.memory_space<vmem>>, vector<1x256xf32>
    %53 = vector.broadcast %52 : vector<1x256xf32> to vector<8x256xf32>
    %54 = arith.mulf %51, %53 : vector<8x256xf32>
    %c188_i32 = arith.constant 188 : i32
    %55 = tpu.dynamic_rotate %26 by %c188_i32 dim 1 : vector<8x256xf32>, i32 -> vector<8x256xf32>
    %c8 = arith.constant 8 : index
    %c0_32 = arith.constant 0 : index
    %56 = vector.load %arg6[%c8, %c0_32] : memref<9x256xf32, #tpu.memory_space<vmem>>, vector<1x256xf32>
    %57 = vector.broadcast %56 : vector<1x256xf32> to vector<8x256xf32>
    %58 = arith.mulf %55, %57 : vector<8x256xf32>
    %59 = tpu.concatenate %30, %34, %38, %42, %26, %46, %50, %54, %58 in 0 : vector<8x256xf32>, vector<8x256xf32>, vector<8x256xf32>, vector<8x256xf32>, vector<8x256xf32>, vector<8x256xf32>, vector<8x256xf32>, vector<8x256xf32>, vector<8x256xf32> -> vector<72x256xf32>
    %60 = arith.truncf %59 : vector<72x256xf32> to vector<72x256xbf16>
    %cst_33 = arith.constant dense<0.000000e+00> : vector<4x256xf32>
    %61 = tpu.matmul %7, %60, %cst_33 {dimension_numbers = #tpu.dot_dimension_numbers<[1], [0], [0], [1], [0, 0, 1, 1], [], []>} : vector<4x72xbf16>, vector<72x256xbf16>, vector<4x256xf32> -> vector<4x256xf32>
    %62 = vector.broadcast %2 : vector<4x1xf32> to vector<4x256xf32>
    %63 = arith.mulf %61, %62 : vector<4x256xf32>
    %64 = vector.broadcast %3 : vector<4x1xf32> to vector<4x256xf32>
    %65 = arith.addf %63, %64 : vector<4x256xf32>
    %cst_34 = arith.constant 0.000000e+00 : f32
    %66 = vector.broadcast %cst_34 : f32 to vector<4x256xf32>
    %67 = arith.maximumf %65, %66 : vector<4x256xf32>
    %68 = vector.broadcast %4 : vector<4x1xf32> to vector<4x256xf32>
    %69 = arith.mulf %67, %68 : vector<4x256xf32>
    %cst_35 = arith.constant dense<0.000000e+00> : vector<256xf32>
    %70 = vector.multi_reduction <add>, %69, %cst_35 [0] : vector<4x256xf32> to vector<256xf32>
    %71 = vector.shape_cast %70 : vector<256xf32> to vector<1x256xf32>
    %72 = vector.broadcast %5 : vector<1x1xf32> to vector<1x256xf32>
    %73 = arith.addf %71, %72 : vector<1x256xf32>
    %74 = vector.broadcast %20 : vector<64x1xf32> to vector<64x256xf32>
    %75 = vector.broadcast %73 : vector<1x256xf32> to vector<64x256xf32>
    %76 = arith.addf %74, %75 : vector<64x256xf32>
    %77 = arith.negf %76 : vector<64x256xf32>
    %78 = math.exp %77 : vector<64x256xf32>
    %cst_36 = arith.constant 1.000000e+00 : f32
    %79 = vector.broadcast %cst_36 : f32 to vector<64x256xf32>
    %80 = arith.addf %79, %78 : vector<64x256xf32>
    %81 = arith.divf %79, %80 : vector<64x256xf32>
    %82 = arith.mulf %10, %81 : vector<64x256xf32>
    %c0_37 = arith.constant 0 : index
    %c0_38 = arith.constant 0 : index
    %c0_39 = arith.constant 0 : index
    %83 = vector.load %arg7[%c0_37, %c0_38, %c0_39] : memref<1x64x256xf32, #tpu.memory_space<vmem>>, vector<1x64x256xf32>
    %84 = vector.shape_cast %83 : vector<1x64x256xf32> to vector<64x256xf32>
    %85 = vector.shape_cast %82 : vector<64x256xf32> to vector<1x64x256xf32>
    tpu.vector_store %arg7[%c0_37, %c0_38, %c0_39], %85 {strides = array<i32>} : memref<1x64x256xf32, #tpu.memory_space<vmem>>, vector<1x64x256xf32>,
    return
  }
  func.func @transform_0(%arg0: i32) -> (i32, i32, i32) {
    %c0_i32 = arith.constant 0 : i32
    %c0_i32_0 = arith.constant 0 : i32
    %c0_i32_1 = arith.constant 0 : i32
    return %arg0, %c0_i32, %c0_i32_0 : i32, i32, i32
  }
  func.func @transform_1(%arg0: i32) -> (i32, i32) {
    %c0_i32 = arith.constant 0 : i32
    %c0_i32_0 = arith.constant 0 : i32
    %c0_i32_1 = arith.constant 0 : i32
    return %c0_i32, %c0_i32_0 : i32, i32
  }
  func.func @transform_2(%arg0: i32) -> (i32, i32) {
    %c0_i32 = arith.constant 0 : i32
    %c0_i32_0 = arith.constant 0 : i32
    %c0_i32_1 = arith.constant 0 : i32
    return %c0_i32, %c0_i32_0 : i32, i32
  }
  func.func @transform_3(%arg0: i32) -> (i32, i32) {
    %c0_i32 = arith.constant 0 : i32
    %c0_i32_0 = arith.constant 0 : i32
    %c0_i32_1 = arith.constant 0 : i32
    return %c0_i32, %c0_i32_0 : i32, i32
  }
  func.func @transform_4(%arg0: i32) -> (i32, i32) {
    %c0_i32 = arith.constant 0 : i32
    %c0_i32_0 = arith.constant 0 : i32
    %c0_i32_1 = arith.constant 0 : i32
    return %c0_i32, %c0_i32_0 : i32, i32
  }
  func.func @transform_5(%arg0: i32) -> (i32, i32) {
    %c0_i32 = arith.constant 0 : i32
    %c0_i32_0 = arith.constant 0 : i32
    %c0_i32_1 = arith.constant 0 : i32
    return %c0_i32, %c0_i32_0 : i32, i32
  }
  func.func @transform_6(%arg0: i32) -> (i32, i32, i32) {
    %c0_i32 = arith.constant 0 : i32
    %c0_i32_0 = arith.constant 0 : i32
    %c0_i32_1 = arith.constant 0 : i32
    return %arg0, %c0_i32, %c0_i32_0 : i32, i32, i32
  }
}

</mosaic_0001>

<bundles_post_ra>
// kernel: tpu_custom_call.1
= control target key start
LH: loop header
LB: loop body
LE: loop exit
PB: predicated region body
PF: predicated region fallthrough
CT: control target
= control target key end

     0   :  { %11 = vsyncpa [#allocation3], 0  ;;  %s1810_s0 = inlined_call_operand.hbm [shape: f32[2,64,256], index: 0, kind: input, shape index: {}]   ;;  %s1811_s1 = inlined_call_operand.vmem [shape: bf16[8,64], index: 1, kind: input, shape index: {}]   ;;  %s1812_s2 = inlined_call_operand.vmem [shape: f32[64,4], index: 2, kind: input, shape index: {}]   ;;  %s1813_s3 = inlined_call_operand.vmem [shape: bf16[4,72], index: 3, kind: input, shape index: {}]   ;;  %s1814_s4 = inlined_call_operand.vmem [shape: f32[8,8], index: 4, kind: input, shape index: {}]   ;;  %s1815_s5 = inlined_call_operand.vmem [shape: f32[9,256], index: 5, kind: input, shape index: {}]   ;;  %s1816_s6 = inlined_call_operand.hbm [shape: f32[2,64,256], index: 6, kind: output, shape index: {}]  }
   0x1   :  { %13 = vsyncpa [#allocation3 + $0x1], 0 }
   0x2   :  { %14 = vsyncpa [#allocation4], 0 }
   0x3   :  { %16 = vsyncpa [#allocation4 + $0x1], 0  ;;  %s1400_s21 = smov 0   ;;  %s1402_s22 = smov 0  }
   0x4   :  { %s1404_s23 = smov 0   ;;  %s1406_s24 = smov 0  }
   0x5 LB: > { %s1421_s25 = sadd.s32 4294967295, %s1346_s24   ;;  %s1047_s26 = sadd.s32 4294967294, %s1346_s24   ;;  %s1346_s24 = sphi %s1406_s24, %s1831_s24   ;;  %s1342_s23 = sphi %s1404_s23, %s1830_s23   ;;  %s1338_s22 = sphi %s1402_s22, %s1829_s22   ;;  %s1334_s21 = sphi %s1400_s21, %s1828_s21  }
   0x6   : > { %s1425_s27 = sadd.s32 1, %s1346_s24   ;;  %s29_s28 = sadd.s32 1, %s1342_s23 }
   0x7   : > { %s26_s29 = ssub.s32 %s1346_s24, %s1425_s27  ;;  %p36_p0 = scmp.ne.s32.totalorder %s1342_s23, %s1338_s22 }
   0x8   : > { %p27_p1 = scmp.eq.s32.totalorder %s26_s29, 0  ;;  %p37_p2 = scmp.eq.s32.totalorder %s1346_s24, 0 }
   0x9   : > { %p42_p3 = scmp.ne.s32.totalorder %s1338_s22, %s1334_s21  ;;  %p43_p4 = scmp.eq.s32.totalorder %s1421_s25, 0 }
   0xa   : > { %s1437_s30 = scalar_select %p27_p1, %s1342_s23, %s29_s28  }
   0xb   : > { %p1439_p5 = por %p37_p2, %p36_p0  ;;  %p1443_p6 = por %p43_p4, %p42_p3 }
   0xc   : > { %p171_p7 = scmp.eq.s32.totalorder %s1421_s25, 1  ;;  %p177_p8 = scmp.eq.s32.totalorder %s1047_s26, 1 }
   0xd   : > { %s1820_s8 = scalar_select %p1443_p6, 1, 0 }
   0xe   : > { %p1133_p10 = scmp.lt.s32.totalorder %s1346_s24, 2  ;;  %p1450_p11 = por %p171_p7, %p36_p0 }
   0xf   : > { %p1454_p12 = por %p177_p8, %p42_p3  ;;  %s212_s11 = sand.u32 1, %s1342_s23  }
  0x10   : > { %s1821_s9 = scalar_select %p1450_p11, 1, 0 }
  0x11   : > { %s1822_s10 = scalar_select %p1454_p12, 1, 0 }
  0x12   : > { %s1096_s12 = sshll.u32 %s1346_s24, 11  ;;  %s1050_s13 = sshll.u32 %s212_s11, 7 }
  0x13   : > { %s1463_s16 = scalar_lea.hbm %s1810_s0, %s1096_s12  ;;  %s216_s17 = scalar_lea.vmem [#allocation2], %s1050_s13 }
  0x14   : > { %s223_s18 = sshll.u32 %s216_s17, 4  ;;  %p1467_p13 = pnand %p1133_p10, %p1439_p5  ;;  %s1471_s18 = int_to_ptr.vmem [resolvable:$true] %s223_s18 }
  0x15   : > { %s1473_s20 = scalar_lea.sflag [#allocation3], %s212_s11  ;;  %s1254_s26 = scalar_lea.hbm %s1463_s16, 2048 }
  0x16   : > { %p1255_p0 = scmp.ne.s32.totalorder %s1463_s16, %s1254_s26  ;;  %p1256_p1 = pneg %p1467_p13 }
  0x17   : > { %s1259_s12 = scalar_lea.hbm %s1810_s0, 4096  ;;  %p1260_p4 = scmp.lt.s32.totalorder %s1463_s16, %s1810_s0 }
  0x18   : > { %p1257_p2 = pnand %p1256_p1, %p1255_p0  ;;  %p1261_p5 = scmp.lt.s32.totalorder %s1259_s12, %s1254_s26 }
  0x1a   : > { %p1258_p3 = pneg %p1257_p2  ;;  %p1262_p7 = por %p1261_p5, %p1260_p4 }
  0x1c   : > { %p1263_p8 = pnand %p1262_p7, %p1258_p3 }
  0x1e   : > { %1266 = shalt.err (!%p1263_p8)
}
  0x1f   : > { %s1267_s11 = scalar_lea.vmem %s1471_s18, 2048  ;;  %s1348_s14 = smov [#allocation2]  }
  0x20   : > { %p1268_p10 = scmp.ne.s32.totalorder %s1471_s18, %s1267_s11  ;;  %s1272_s15 = sshll.u32 %s1348_s14, 4  ;;  %s1273_s15 = int_to_ptr.vmem [resolvable:$false] %s1272_s15 }
  0x21   : > { %s1274_s17 = scalar_lea.vmem %s1273_s15, 4096  ;;  %p1275_p2 = scmp.lt.s32.totalorder %s1471_s18, %s1273_s15 }
  0x22   : > { %p1270_p9 = pnand %p1268_p10, %p1256_p1  ;;  %p1276_p12 = scmp.lt.s32.totalorder %s1274_s17, %s1267_s11 }
  0x24   : > { %p1271_p0 = pneg %p1270_p9  ;;  %p1277_p11 = por %p1276_p12, %p1275_p2 }
  0x26   : > { %p1278_p6 = pnand %p1277_p11, %p1271_p0 }
  0x28   : > { %1281 = shalt.err (!%p1278_p6)
}
  0x29   : > { %s1349_s26 = smov 256   ;;  %s1350_s28 = smov 16  }
  0x2a   : > { %1128 = dma.hbm_to_vmem [thread:$0]  (!%p1467_p13), %s1463_s16, 2048, %s1471_s18, %s1473_s20, %s1349_s26, %s1349_s26, %s1350_s28  }
  0x2b   : > { %p1053_p9 = scmp.ge.s32.totalorder %s1346_s24, 1  ;;  %p231_p1 = scmp.lt.s32.totalorder %s1346_s24, 3 }
  0x2d   : > { %p232_p3 = pnand %p1053_p9, %p231_p1 }
  0x2e   : > { %s1497_s29 = sand.u32 (!%p232_p3), 1, %s1338_s22   ;;  %p1824_p6 = scmp.ne.s32.totalorder (!%p232_p3), %s1820_s8, 0 }
  0x2f   : > { %235 = sbr.rel (%p232_p3) target bundleno = 803 (0x323), region = 44  ;;  %s1054_s12 = sshll.u32 (!%p232_p3), %s1497_s29, 7 }
  0x30   : > { %s238_s7 = scalar_lea.sflag (!%p232_p3), [#allocation3], %s1497_s29  ;;  %s1503_s13 = scalar_lea.vmem (!%p232_p3), [#allocation2], %s1054_s12 }
  0x34   : > { %1325 = dma.done.wait (%p1824_p6), %s238_s7, 2048  }
  0x35   : > { %1327 = vsyncadd (%p1824_p6), %s238_s7, 4294965248  ;;  %v1351_v0 = vmov 0   ;;  %v1512_v1 = vld [vmem:[%s1503_s13 + $0x68] sm:$0xff]  ;;  %v1515_v2 = vld [vmem:[%s1503_s13 + $0x78] sm:$0xff]  ;;  %v1352_v25 = vmov 1   ;;  %vm308_vm0 = vcmask 523264   ;;  %v513_v50 = vlaneseq }
  0x36   : > { %344 = vmatprep.mubr.bf16.mxu0 %v1351_v0  ;;  %1182 = vset.pattern.permute.xlu0 %v1351_v0  ;;  %v1518_v3 = vld [vmem:[%s1503_s13 + $0x60] sm:$0xff]  ;;  %v307_v4 = vpack.c.bf16 %v1515_v2, %v1512_v1  ;;  %v1523_v5 = vld [vmem:[%s1503_s13 + $0x70] sm:$0xff]  ;;  %v1526_v6 = vld [vmem:[%s1503_s13 + $0x48] sm:$0xff]  ;;  %s1353_s20 = smov 68   ;;  %s1354_s11 = smov 60   ;;  %vm361_vm1 = vcmask 31744  }
  0x37   : > { %v1529_v7 = vld [vmem:[%s1503_s13 + $0x58] sm:$0xff]  ;;  %v306_v8 = vpack.c.bf16 %v1523_v5, %v1518_v3  ;;  %v1536_v10 = vld [vmem:[%s1503_s13 + $0x40] sm:$0xff]  ;;  %v1539_v11 = vld [vmem:[%s1503_s13 + $0x50] sm:$0xff]  ;;  %s1355_s14 = smov 64   ;;  %s1356_s26 = smov 124   ;;  %v1358_v43 = vmov 2  }
  0x38   : > { %v305_v9 = vpack.c.bf16 %v1529_v7, %v1526_v6  ;;  %v1542_v12 = vld [vmem:[%s1503_s13 + $0x28] sm:$0xff]  ;;  %320 = vmatprep.subr.bf16.mxu0 %v307_v4  ;;  %v1545_v13 = vld [vmem:[%s1503_s13 + $0x38] sm:$0xff]  ;;  %v304_v14 = vpack.c.bf16 %v1539_v11, %v1536_v10  ;;  %v1552_v16 = vld [vmem:[%s1503_s13 + $0x20] sm:$0xff]  ;;  %s1357_s28 = smov 4   ;;  %1184 = vset.pattern.permute.xlu1 %v1358_v43  ;;  %v1359_v44 = vmov 3   ;;  %v1360_v45 = vmov 4  }
  0x39   : > { %321 = vmatpush1.bf16.msra.mxu0 %v306_v8  ;;  %v303_v15 = vpack.c.bf16 %v1545_v13, %v1542_v12  ;;  %v1555_v17 = vld [vmem:[%s1503_s13 + $0x30] sm:$0xff]  ;;  %v271_v18 = vld [vmem:[%s1814_s4] sm:$0xff]  ;;  %v1561_v19 = vld [vmem:[%s1503_s13 + $0x8] sm:$0xff]  ;;  %v1361_v47 = vmov 5   ;;  %v521_v51 = vshrl.u32 %v513_v50, 7  ;;  %v1610_v54 = vand.u32 127, %v513_v50 }
  0x3a   : > { %322 = vmatprep.subr.bf16.mxu0 %v305_v9  ;;  %v1564_v20 = vld [vmem:[%s1503_s13 + $0x18] sm:$0xff]  ;;  %496 = vperm.xlu0 %1182, %v271_v18   ;;  %v302_v21 = vpack.c.bf16 %v1555_v17, %v1552_v16  ;;  %v1571_v23 = vld [vmem:[%s1503_s13] sm:$0xff]  ;;  %v1574_v24 = vld [vmem:[%s1503_s13 + $0x10] sm:$0xff]  ;;  %vm386_vm4 = vcmask 1043456   ;;  %vm675_vm8 = vcmask 588800   ;;  %s1728_s17 = scalar_lea.vmem [#allocation5], %s1054_s12 }
  0x3b   : > { %v301_v22 = vpack.c.bf16 %v1564_v20, %v1561_v19  ;;  %v300_v26 = vpack.c.bf16 %v1574_v24, %v1571_v23  ;;  %v274_v27 = vld [vmem:[%s1811_s1] sm:$0xf]  ;;  %v1072_v53 = vld [vmem:[%s1815_s5 + $0x10] ss:$8 sm:$0x3]  ;;  %v1612_v55 = vsub.s32 0, %v521_v51 }
  0x3c   : > { %v276_v41 = vld [vmem:[%s1812_s2] sm:$0xff]  ;;  %v1614_v56 = vsub.s32 1, %v521_v51  ;;  %vm558_vm2 = vcmp.lt.s32.totalorder %v1610_v54, 60  ;;  %vm515_vm3 = vcmp.lt.s32.totalorder %v1610_v54, 68  ;;  %vm536_vm5 = vcmp.lt.s32.totalorder %v1610_v54, 64  ;;  %s1097_s12 = sshll.u32 %s1421_s25, 11 }
  0x3d   : > { %323 = vmatpush1.bf16.msra.mxu0 %v304_v14  ;;  %1109 = vmatprep.mubr.msk.f32.mxu1 %vm361_vm1, %v276_v41  ;;  %v272_v42 = vld [vmem:[%s1814_s4] sm:$0xf]  ;;  %v1070_v58 = vld [vmem:[%s1815_s5 + $0x6] ss:$8 sm:$0x3]  ;;  %v656_v60 = vrot.slane %v1072_v53, %v1612_v55  ;;  %vm602_vm6 = vcmp.lt.s32.totalorder %v1610_v54, 124  ;;  %s1762_s13 = scalar_lea.hbm %s1816_s6, %s1097_s12 }
  0x3e   : > { %324 = vmatprep.subr.bf16.mxu0 %v303_v15  ;;  %1183 = vset.pattern.permute.xlu0 %v1352_v25  ;;  %v273_v46 = vld [vmem:[%s1814_s4] sm:$0x1]  ;;  %v660_v61 = vrot.slane %v1072_v53, %v1614_v56  ;;  %v1071_v63 = vld [vmem:[%s1815_s5 + $0x7] ss:$8 sm:$0x3]  ;;  %v626_v4 = vrot.slane %v1070_v58, %v1612_v55  ;;  %v630_v8 = vrot.slane %v1070_v58, %v1614_v56  ;;  %vm580_vm7 = vcmp.lt.s32.totalorder %v1610_v54, 4 }
  0x3f   : > { %502 = vperm.xlu0 %1183, %v271_v18   ;;  %v280_v51 = vld [vmem:[%s1812_s2 + $0x20] sm:$0xff]  ;;  %s961_s25 = scalar_lea.sflag [#allocation4], %s1497_s29  ;;  %p1825_p12 = scmp.ne.s32.totalorder %s1821_s9, 0 }
  0x40   : > { %v1066_v53 = vld [vmem:[%s1815_s5 + $0x1] ss:$8 sm:$0x3]  ;;  %s1362_s16 = smov [#allocation5]  }
  0x41   : > { %325 = vmatpush1.bf16.msra.mxu0 %v302_v21  ;;  %s1286_s18 = sshll.u32 %s1362_s16, 4  ;;  %s1287_s18 = int_to_ptr.vmem [resolvable:$false] %s1286_s18 }
  0x42   : > { %326 = vmatprep.subr.bf16.mxu0 %v301_v22  ;;  %s1288_s19 = scalar_lea.vmem %s1287_s18, 4096 }
  0x43   : > { %1185 = vset.pattern.permute.xlu0 %v1359_v44 }
  0x45   : > { %327 = vmatpush1.bf16.msra.mxu0 %v300_v26  ;;  %v641_v26 = vrot.slane %v1071_v63, %v1612_v55 }
  0x48   : > { %1056 = vmatmul.mubr.msk.bf16.vlgmr.msra.gmra.mxu0 %vm308_vm0, %v274_v27  ;;  %v645_v27 = vrot.slane %v1071_v63, %v1614_v56 }
  0xb5   : > { %v497_v28 = vpop.permute.xlu0 %496 }
  0xba   : > { %v503_v30 = vpop.permute.xlu0 %502 }
 0x108   : > { %v346_v29 = vpop.f32.mrf.mxu0 }
 0x109   : > { %v499_v31 = vmul.f32 %v497_v28, %v346_v29 }
 0x10a   : > { %v348_v32 = vpop.f32.mrf.mxu0 }
 0x10b   : > { %v500_v33 = vmul.f32 %v497_v28, %v348_v32  ;;  %v505_v34 = vadd.f32 %v503_v30, %v499_v31  ;;  %v353_v35 = vadd.f32 %v348_v32, %v346_v29  ;;  %v277_v28 = vld [vmem:[%s1812_s2 + $0x8] sm:$0xff] }
 0x10c   : > { %v350_v36 = vpop.f32.mrf.mxu0  ;;  %v1069_v29 = vld [vmem:[%s1815_s5 + $0x5] ss:$8 sm:$0x3] }
 0x10d   : > { %v506_v37 = vadd.f32 %v503_v30, %v500_v33  ;;  %v1581_v38 = vmax.f32 %v505_v34, 0.0  ;;  %354 = vadd.xlane.f32.xlu1 %v353_v35  ;;  %v278_v35 = vld [vmem:[%s1812_s2 + $0x10] sm:$0xff]  ;;  %v1067_v36 = vld [vmem:[%s1815_s5 + $0x2] ss:$8 sm:$0x3]  ;;  %v611_v41 = vrot.slane %v1069_v29, %v1612_v55 }
 0x10e   : > { %v351_v39 = vpop.f32.mrf.mxu0 }
 0x10f   : > { %509 = vrot.lane.b32.xlu0 %v1581_v38, %s1353_s20  ;;  %v1584_v40 = vmax.f32 %v506_v37, 0.0 }
 0x113   : > { %556 = vrot.lane.b32.xlu0 %v1584_v40, %s1354_s11 }
 0x117   : > { %511 = vrot.lane.b32.xlu0 %v1584_v40, %s1353_s20 }
 0x11b   : > { %534 = vrot.lane.b32.xlu0 %v1584_v40, %s1355_s14 }
 0x11e   : > { %554 = vrot.lane.b32.xlu1 %v1581_v38, %s1354_s11 }
 0x11f   : > { %600 = vrot.lane.b32.xlu0 %v1584_v40, %s1356_s26 }
 0x122   : > { %532 = vrot.lane.b32.xlu1 %v1581_v38, %s1355_s14 }
 0x123   : > { %578 = vrot.lane.b32.xlu0 %v1584_v40, %s1357_s28 }
 0x126   : > { %598 = vrot.lane.b32.xlu1 %v1581_v38, %s1356_s26  ;;  %s974_s26 = sshll.u32 %s1728_s17, 4  ;;  %s1764_s26 = int_to_ptr.vmem [resolvable:$true] %s974_s26 }
 0x127   : > { %734 = vperm.xlu0 %1185, %v272_v42   ;;  %s1282_s8 = scalar_lea.vmem %s1764_s26, 2048  ;;  %p1289_p5 = scmp.lt.s32.totalorder %s1764_s26, %s1287_s18 }
 0x128   : > { %p1283_p11 = scmp.ne.s32.totalorder %s1764_s26, %s1282_s8  ;;  %p1290_p7 = scmp.lt.s32.totalorder %s1288_s19, %s1282_s8 }
 0x12a   : > { %576 = vrot.lane.b32.xlu1 %v1581_v38, %s1357_s28  ;;  %p1284_p13 = pnand %p1283_p11, %p1825_p12  ;;  %p1291_p8 = por %p1290_p7, %p1289_p5 }
 0x12b   : > { %1189 = vset.pattern.permute.xlu0 %v1351_v0 }
 0x12c   : > { %p1285_p4 = pneg %p1284_p13 }
 0x12e   : > { %728 = vperm.xlu1 %1184, %v272_v42   ;;  %p1292_p10 = pnand %p1291_p8, %p1285_p4 }
 0x132   : > { %1186 = vset.pattern.permute.xlu1 %v1360_v45 }
 0x133   : > { %742 = vperm.xlu1 %1186, %v272_v42   ;;  %v615_v42 = vrot.slane %v1069_v29, %v1614_v56 }
 0x137   : > { %1187 = vset.pattern.permute.xlu1 %v1361_v47 }
 0x138   : > { %763 = vperm.xlu1 %1187, %v273_v46  }
 0x13c   : > { %1188 = vset.pattern.permute.xlu1 %v1351_v0 }
 0x181   : > { %v510_v48 = vpop.permute.xlu0 %509 }
 0x185   : > { %v557_v49 = vpop.permute.xlu0 %556 }
 0x189   : > { %v512_v52 = vpop.permute.xlu0 %511 }
 0x18a   : > { %v1642_v30 = vsel %vm515_vm3, %v510_v48, %v512_v52  ;;  %v1646_v31 = vsel %vm515_vm3, %v512_v52, %v510_v48  ;;  %v279_v48 = vld [vmem:[%s1812_s2 + $0x18] sm:$0xff]  ;;  %v567_v52 = vrot.slane %v1067_v36, %v1612_v55 }
 0x18b   : > { %v633_v43 = vmul.f32 %v626_v4, %v1642_v30  ;;  %v634_v44 = vmul.f32 %v630_v8, %v1646_v31 }
 0x18d   : > { %v535_v9 = vpop.permute.xlu0 %534 }
 0x191   : > { %v601_v45 = vpop.permute.xlu0 %600 }
 0x196   : > { %v355_v57 = vpop.xlane.xlu1 %354 }
 0x197   : > { %v357_v59 = vmul.f32 0.00390625, %v355_v57 }
 0x199   : > { %v358_v62 = vmax.f32 %v357_v59, 0.0 }
 0x19a   : > { %v555_v14 = vpop.permute.xlu1 %554 }
 0x19b   : > { %v1628_v15 = vsel %vm558_vm2, %v555_v14, %v557_v49  ;;  %v560_v18 = vsel %vm558_vm2, %v557_v49, %v555_v14  ;;  %v360_v21 = vrot.slane %v358_v62, 4  ;;  %v1068_v49 = vld [vmem:[%s1815_s5 + $0x3] ss:$8 sm:$0x3] }
 0x19c   : > { %v663_v22 = vmul.f32 %v656_v60, %v1628_v15  ;;  %v664_v25 = vmul.f32 %v660_v61, %v560_v18  ;;  %v518_v60 = vld [vmem:[%s1815_s5] ss:$8 sm:$0x3]  ;;  %v571_v61 = vrot.slane %v1067_v36, %v1614_v56  ;;  %v589_v4 = vrot.slane %v1068_v49, %v1612_v55 }
 0x19d   : > { %1107 = vmatprep.subr.msk.mxu1 %vm386_vm4, %v360_v21  ;;  %v593_v14 = vrot.slane %v1068_v49, %v1614_v56 }
 0x19e   : > { %v673_v32 = vpack.c.bf16 %v663_v22, %v663_v22  ;;  %v674_v33 = vpack.c.bf16 %v664_v25, %v664_v25  ;;  %1108 = vmatpush3.msk.msra.mxu1 %vm386_vm4, %v360_v21  ;;  %v533_v34 = vpop.permute.xlu1 %532  ;;  %v281_v21 = vld [vmem:[%s1812_s2 + $0x28] sm:$0xff]  ;;  %v549_v22 = vrot.slane %v1066_v53, %v1614_v56  ;;  %v282_v25 = vld [vmem:[%s1812_s2 + $0x30] sm:$0xff]  ;;  %v575_v36 = vmul.f32 %v571_v61, %v1628_v15 }
 0x19f   : > { %v537_v37 = vsel %vm536_vm5, %v533_v34, %v535_v9  ;;  %v538_v39 = vsel %vm536_vm5, %v535_v9, %v533_v34  ;;  %1110 = vmatmul.mubr.msk.f32.vlgmr.msra.gmra.mxu1 %vm361_vm1, %v277_v28 }
 0x1a0   : > { %v648_v46 = vmul.f32 %v641_v26, %v537_v37  ;;  %v649_v47 = vmul.f32 %v645_v27, %v538_v39  ;;  %1073 = vmatprep.subr.msk.bf16.mxu1 %vm386_vm4, %v674_v33  ;;  %v680_v50 = vsel %vm386_vm4, %v673_v32, 0  ;;  %1112 = vmatprep.mubr.msk.f32.mxu1 %vm361_vm1, %v278_v35  ;;  %v527_v26 = vrot.slane %v518_v60, %v1614_v56  ;;  %v579_v27 = vpop.permute.xlu0 %578 }
 0x1a1   : > { %692 = vmatpush1.bf16.msra.mxu1 %v680_v50  ;;  %v574_v32 = vmul.f32 %v567_v52, %v560_v18  ;;  %v545_v33 = vrot.slane %v1066_v53, %v1612_v55  ;;  %v553_v56 = vmul.f32 %v549_v22, %v537_v37  ;;  %v275_v37 = vld [vmem:[%s1813_s3] sm:$0x3] }
 0x1a2   : > { %v671_v57 = vpack.c.bf16 %v648_v46, %v633_v43  ;;  %v599_v58 = vpop.permute.xlu1 %598  ;;  %v672_v59 = vpack.c.bf16 %v649_v47, %v634_v44  ;;  %v531_v44 = vmul.f32 %v527_v26, %v1642_v30 }
 0x1a3   : > { %v603_v62 = vsel %vm602_vm6, %v599_v58, %v601_v45  ;;  %v604_v63 = vsel %vm602_vm6, %v601_v45, %v599_v58  ;;  %1113 = vmatmul.mubr.msk.f32.gmra.mxu1 %vm361_vm1, %v279_v48  ;;  %v552_v15 = vmul.f32 %v545_v33, %v538_v39 }
 0x1a4   : > { %v618_v8 = vmul.f32 %v611_v41, %v603_v62  ;;  %v619_v9 = vmul.f32 %v615_v42, %v604_v63  ;;  %693 = vmatprep.subr.bf16.mxu1 %v672_v59  ;;  %1115 = vmatprep.mubr.msk.f32.mxu1 %vm361_vm1, %v280_v51  ;;  %v666_v45 = vpack.c.bf16 %v553_v56, %v531_v44  ;;  %v735_v62 = vpop.permute.xlu0 %734 }
 0x1a5   : > { %694 = vmatpush1.bf16.msra.mxu1 %v671_v57 }
 0x1a6   : > { %v669_v28 = vpack.c.bf16 %v618_v8, %v1581_v38  ;;  %v577_v29 = vpop.permute.xlu1 %576  ;;  %v670_v54 = vpack.c.bf16 %v619_v9, %v1584_v40  ;;  %v283_v38 = vld [vmem:[%s1812_s2 + $0x38] sm:$0xff]  ;;  %v523_v40 = vrot.slane %v518_v60, %v1612_v55 }
 0x1a7   : > { %v581_v34 = vsel %vm580_vm7, %v577_v29, %v579_v27  ;;  %v582_v35 = vsel %vm580_vm7, %v579_v27, %v577_v29  ;;  %1116 = vmatmul.mubr.msk.f32.gmra.mxu1 %vm361_vm1, %v281_v21 }
 0x1a8   : > { %v596_v41 = vmul.f32 %v589_v4, %v582_v35  ;;  %v597_v42 = vmul.f32 %v593_v14, %v581_v34  ;;  %695 = vmatprep.subr.bf16.mxu1 %v670_v54  ;;  %1118 = vmatprep.mubr.msk.f32.mxu1 %vm361_vm1, %v282_v25  ;;  %v530_v46 = vmul.f32 %v523_v40, %v1646_v31 }
 0x1a9   : > { %696 = vmatpush1.bf16.msra.mxu1 %v669_v28 }
 0x1aa   : > { %v667_v18 = vpack.c.bf16 %v596_v41, %v574_v32  ;;  %v668_v43 = vpack.c.bf16 %v597_v42, %v575_v36  ;;  %v665_v47 = vpack.c.bf16 %v552_v15, %v530_v46  ;;  %v729_v59 = vpop.permute.xlu1 %728 }
 0x1ab   : > { %1119 = vmatmul.mubr.msk.f32.gmra.mxu1 %vm361_vm1, %v283_v38 }
 0x1ac   : > { %697 = vmatprep.subr.bf16.mxu1 %v668_v43  ;;  %717 = vmatprep.mubr.bf16.mxu1 %v1351_v0 }
 0x1ad   : > { %698 = vmatpush1.bf16.msra.mxu1 %v667_v18 }
 0x1ae   : > { %699 = vmatprep.subr.bf16.mxu1 %v666_v45  ;;  %v743_v14 = vpop.permute.xlu1 %742 }
 0x1b1   : > { %700 = vmatpush1.bf16.msra.mxu1 %v665_v47 }
 0x1b3   : > { %v764_v56 = vpop.permute.xlu1 %763 }
 0x1b4   : > { %1074 = vmatmul.mubr.msk.bf16.vlgmr.msra.gmra.mxu1 %vm675_vm8, %v275_v37 }
 0x25f   : > { %v1111_v30 = vpop.f32.mrf.mxu1 }
 0x260   : > { %775 = vperm.xlu1 %1188, %v1111_v30  }
 0x261   : > { %v455_v48 = vpop.f32.mrf.mxu1 }
 0x262   : > { %770 = vperm.xlu0 %1189, %v455_v48  }
 0x263   : > { %v1114_v39 = vpop.f32.mrf.mxu1 }
 0x265   : > { %v465_v49 = vpop.f32.mrf.mxu1 }
 0x266   : > { %785 = vperm.xlu0 %1189, %v1114_v39   ;;  %780 = vperm.xlu1 %1188, %v465_v49  }
 0x267   : > { %v1117_v0 = vpop.f32.mrf.mxu1 }
 0x269   : > { %v475_v31 = vpop.f32.mrf.mxu1 }
 0x26a   : > { %795 = vperm.xlu0 %1189, %v1117_v0   ;;  %790 = vperm.xlu1 %1188, %v475_v31  }
 0x26b   : > { %v1120_v50 = vpop.f32.mrf.mxu1 }
 0x26d   : > { %v485_v51 = vpop.f32.mrf.mxu1 }
 0x26e   : > { %805 = vperm.xlu0 %1189, %v1120_v50   ;;  %800 = vperm.xlu1 %1188, %v485_v51  }
 0x274   : > { %v719_v52 = vpop.f32.mrf.mxu1 }
 0x275   : > { %v731_v60 = vmul.f32 %v729_v59, %v719_v52 }
 0x276   : > { %v721_v53 = vpop.f32.mrf.mxu1 }
 0x277   : > { %v732_v61 = vmul.f32 %v729_v59, %v721_v53  ;;  %v737_v63 = vadd.f32 %v735_v62, %v731_v60 }
 0x278   : > { %v723_v57 = vpop.f32.mrf.mxu1 }
 0x279   : > { %v738_v4 = vadd.f32 %v735_v62, %v732_v61  ;;  %v739_v8 = vmax.f32 %v737_v63, 0.0 }
 0x27a   : > { %v724_v58 = vpop.f32.mrf.mxu1 }
 0x27b   : > { %v740_v9 = vmax.f32 %v738_v4, 0.0  ;;  %v745_v21 = vmul.f32 %v743_v14, %v739_v8 }
 0x27d   : > { %v746_v22 = vmul.f32 %v743_v14, %v740_v9  ;;  %v747_v25 = vsel %vm386_vm4, %v745_v21, 0.0 }
 0x27e   : > { %v748_v27 = vrot.slane %v747_v25, 4 }
 0x27f   : > { %v754_v26 = vsel %vm386_vm4, %v746_v22, 0.0 }
 0x280   : > { %v755_v28 = vrot.slane %v754_v26, 4  ;;  %v749_v29 = vadd.f32 %v748_v27, %v747_v25 }
 0x282   : > { %v756_v54 = vadd.f32 %v755_v28, %v754_v26  ;;  %v750_v32 = vrot.slane %v749_v29, 2 }
 0x284   : > { %v757_v33 = vrot.slane %v756_v54, 2  ;;  %v751_v34 = vadd.f32 %v750_v32, %v749_v29 }
 0x286   : > { %v758_v35 = vadd.f32 %v757_v33, %v756_v54  ;;  %v752_v36 = vrot.slane %v751_v34, 1 }
 0x288   : > { %v759_v41 = vrot.slane %v758_v35, 1  ;;  %v753_v42 = vadd.f32 %v752_v36, %v751_v34 }
 0x28a   : > { %v760_v38 = vadd.f32 %v759_v41, %v758_v35  ;;  %v766_v40 = vadd.f32 %v764_v56, %v753_v42 }
 0x28c   : > { %v767_v18 = vadd.f32 %v764_v56, %v760_v38  ;;  %v811_v43 = vrot.slane %v766_v40, %v1612_v55 }
 0x28e   : > { %v815_v44 = vrot.slane %v767_v18, %v1612_v55 }
 0x2db   : > { %v776_v15 = vpop.permute.xlu1 %775 }
 0x2dc   : > { %v818_v45 = vadd.f32 %v811_v43, %v776_v15  ;;  %v819_v46 = vadd.f32 %v815_v44, %v776_v15 }
 0x2dd   : > { %v771_v47 = vpop.permute.xlu0 %770 }
 0x2de   : > { %v1077_v37 = vmul.f32 -1.442695, %v818_v45  ;;  %v1078_v30 = vmul.f32 -1.442695, %v819_v46  ;;  %v816_v48 = vadd.f32 %v811_v43, %v771_v47  ;;  %v817_v39 = vadd.f32 %v815_v44, %v771_v47 }
 0x2e0   : > { %1190 = vpow2.f32 %v1077_v37  ;;  %v1075_v49 = vmul.f32 -1.442695, %v816_v48  ;;  %v1076_v0 = vmul.f32 -1.442695, %v817_v39 }
 0x2e1   : > { %1192 = vpow2.f32 %v1078_v30  ;;  %v786_v31 = vpop.permute.xlu0 %785  ;;  %v781_v50 = vpop.permute.xlu1 %780 }
 0x2e2   : > { %1194 = vpow2.f32 %v1075_v49  ;;  %v822_v51 = vadd.f32 %v811_v43, %v786_v31  ;;  %v823_v52 = vadd.f32 %v815_v44, %v786_v31  ;;  %v820_v53 = vadd.f32 %v811_v43, %v781_v50 }
 0x2e3   : > { %1196 = vpow2.f32 %v1076_v0  ;;  %v821_v55 = vadd.f32 %v815_v44, %v781_v50 }
 0x2e4   : > { %v1081_v57 = vmul.f32 -1.442695, %v822_v51  ;;  %v1082_v58 = vmul.f32 -1.442695, %v823_v52  ;;  %v1079_v59 = vmul.f32 -1.442695, %v820_v53 }
 0x2e5   : > { %v1080_v60 = vmul.f32 -1.442695, %v821_v55  ;;  %v796_v61 = vpop.permute.xlu0 %795  ;;  %v791_v62 = vpop.permute.xlu1 %790 }
 0x2e6   : > { %1198 = vpow2.f32 %v1081_v57  ;;  %v826_v63 = vadd.f32 %v811_v43, %v796_v61  ;;  %v827_v4 = vadd.f32 %v815_v44, %v796_v61  ;;  %v824_v8 = vadd.f32 %v811_v43, %v791_v62 }
 0x2e7   : > { %1200 = vpow2.f32 %v1082_v58  ;;  %v825_v9 = vadd.f32 %v815_v44, %v791_v62 }
 0x2e8   : > { %1202 = vpow2.f32 %v1079_v59  ;;  %v1085_v14 = vmul.f32 -1.442695, %v826_v63  ;;  %v1086_v21 = vmul.f32 -1.442695, %v827_v4  ;;  %v1083_v22 = vmul.f32 -1.442695, %v824_v8 }
 0x2e9   : > { %1204 = vpow2.f32 %v1080_v60  ;;  %v1084_v25 = vmul.f32 -1.442695, %v825_v9  ;;  %v806_v26 = vpop.permute.xlu0 %805  ;;  %v801_v27 = vpop.permute.xlu1 %800 }
 0x2ea   : > { %1206 = vpow2.f32 %v1085_v14  ;;  %v830_v28 = vadd.f32 %v811_v43, %v806_v26  ;;  %v831_v29 = vadd.f32 %v815_v44, %v806_v26  ;;  %v828_v33 = vadd.f32 %v811_v43, %v801_v27 }
 0x2eb   : > { %1208 = vpow2.f32 %v1086_v21  ;;  %v829_v35 = vadd.f32 %v815_v44, %v801_v27 }
 0x2ec   : > { %1210 = vpow2.f32 %v1083_v22  ;;  %v1089_v54 = vmul.f32 -1.442695, %v830_v28  ;;  %v1090_v32 = vmul.f32 -1.442695, %v831_v29  ;;  %v1087_v18 = vmul.f32 -1.442695, %v828_v33 }
 0x2ed   : > { %v1191_v34 = vpop.eup %1190  ;;  %1212 = vpow2.f32 %v1084_v25  ;;  %v1088_v45 = vmul.f32 -1.442695, %v829_v35 }
 0x2ee   : > { %v1193_v36 = vpop.eup %1192  ;;  %v882_v41 = vadd.f32 1.0, %v1191_v34  ;;  %1214 = vpow2.f32 %v1089_v54 }
 0x2ef   : > { %v1195_v42 = vpop.eup %1194  ;;  %v883_v38 = vadd.f32 1.0, %v1193_v36  ;;  %1216 = vpow2.f32 %v1090_v32 }
 0x2f0   : > { %v1197_v56 = vpop.eup %1196  ;;  %1218 = vrcp.f32 %v882_v41  ;;  %v880_v40 = vadd.f32 1.0, %v1195_v42 }
 0x2f1   : > { %1220 = vrcp.f32 %v883_v38  ;;  %v881_v15 = vadd.f32 1.0, %v1197_v56 }
 0x2f2   : > { %1222 = vrcp.f32 %v880_v40 }
 0x2f3   : > { %v1199_v46 = vpop.eup %1198  ;;  %1224 = vrcp.f32 %v881_v15 }
 0x2f4   : > { %v1201_v43 = vpop.eup %1200  ;;  %v886_v47 = vadd.f32 1.0, %v1199_v46  ;;  %1226 = vpow2.f32 %v1087_v18 }
 0x2f5   : > { %v1203_v44 = vpop.eup %1202  ;;  %v887_v37 = vadd.f32 1.0, %v1201_v43  ;;  %1228 = vpow2.f32 %v1088_v45 }
 0x2f6   : > { %v1205_v30 = vpop.eup %1204  ;;  %1230 = vrcp.f32 %v886_v47  ;;  %v884_v48 = vadd.f32 1.0, %v1203_v44 }
 0x2f7   : > { %v1207_v39 = vpop.eup %1206  ;;  %1232 = vrcp.f32 %v887_v37  ;;  %v885_v49 = vadd.f32 1.0, %v1205_v30 }
 0x2f8   : > { %v1209_v0 = vpop.eup %1208  ;;  %1234 = vrcp.f32 %v884_v48  ;;  %v890_v31 = vadd.f32 1.0, %v1207_v39 }
 0x2f9   : > { %v1211_v50 = vpop.eup %1210  ;;  %1236 = vrcp.f32 %v885_v49  ;;  %v891_v51 = vadd.f32 1.0, %v1209_v0 }
 0x2fa   : > { %v1213_v52 = vpop.eup %1212  ;;  %1238 = vrcp.f32 %v890_v31  ;;  %v888_v53 = vadd.f32 1.0, %v1211_v50 }
 0x2fb   : > { %v1215_v55 = vpop.eup %1214  ;;  %1240 = vrcp.f32 %v891_v51  ;;  %v889_v57 = vadd.f32 1.0, %v1213_v52 }
 0x2fc   : > { %v1217_v58 = vpop.eup %1216  ;;  %1242 = vrcp.f32 %v888_v53  ;;  %v894_v59 = vadd.f32 1.0, %v1215_v55 }
 0x2fd   : > { %v1219_v60 = vpop.eup %1218  ;;  %1244 = vrcp.f32 %v889_v57  ;;  %v895_v61 = vadd.f32 1.0, %v1217_v58 }
 0x2fe   : > { %v1221_v62 = vpop.eup %1220  ;;  %v930_v63 = vmul.f32 %v1219_v60, %v1574_v24  ;;  %1246 = vrcp.f32 %v894_v59 }
 0x2ff   : > { %v1223_v4 = vpop.eup %1222  ;;  %v931_v8 = vmul.f32 %v1221_v62, %v1564_v20  ;;  %1248 = vrcp.f32 %v895_v61 }
 0x300   : > { %v1225_v9 = vpop.eup %1224  ;;  %946 = vst [vmem:[%s1728_s17 + $0x10] sm:$0xff] %v930_v63  ;;  %v928_v14 = vmul.f32 %v1223_v4, %v1571_v23 }
 0x301   : > { %v1227_v21 = vpop.eup %1226  ;;  %947 = vst [vmem:[%s1728_s17 + $0x18] sm:$0xff] %v931_v8  ;;  %v929_v24 = vmul.f32 %v1225_v9, %v1561_v19 }
 0x302   : > { %v1229_v22 = vpop.eup %1228  ;;  %944 = vst [vmem:[%s1728_s17] sm:$0xff] %v928_v14  ;;  %v892_v20 = vadd.f32 1.0, %v1227_v21 }
 0x303   : > { %v1231_v25 = vpop.eup %1230  ;;  %945 = vst [vmem:[%s1728_s17 + $0x8] sm:$0xff] %v929_v24  ;;  %v893_v26 = vadd.f32 1.0, %v1229_v22 }
 0x304   : > { %v1233_v27 = vpop.eup %1232  ;;  %v934_v28 = vmul.f32 %v1231_v25, %v1555_v17  ;;  %1250 = vrcp.f32 %v892_v20 }
 0x305   : > { %v1235_v29 = vpop.eup %1234  ;;  %v935_v23 = vmul.f32 %v1233_v27, %v1545_v13  ;;  %1252 = vrcp.f32 %v893_v26 }
 0x306   : > { %v1237_v54 = vpop.eup %1236  ;;  %950 = vst [vmem:[%s1728_s17 + $0x30] sm:$0xff] %v934_v28  ;;  %v932_v19 = vmul.f32 %v1235_v29, %v1552_v16 }
 0x307   : > { %v1239_v32 = vpop.eup %1238  ;;  %951 = vst [vmem:[%s1728_s17 + $0x38] sm:$0xff] %v935_v23  ;;  %v933_v33 = vmul.f32 %v1237_v54, %v1542_v12 }
 0x308   : > { %v1241_v34 = vpop.eup %1240  ;;  %948 = vst [vmem:[%s1728_s17 + $0x20] sm:$0xff] %v932_v19  ;;  %v938_v17 = vmul.f32 %v1239_v32, %v1539_v11 }
 0x309   : > { %v1243_v35 = vpop.eup %1242  ;;  %949 = vst [vmem:[%s1728_s17 + $0x28] sm:$0xff] %v933_v33  ;;  %v939_v13 = vmul.f32 %v1241_v34, %v1529_v7 }
 0x30a   : > { %v1245_v36 = vpop.eup %1244  ;;  %954 = vst [vmem:[%s1728_s17 + $0x50] sm:$0xff] %v938_v17  ;;  %v936_v16 = vmul.f32 %v1243_v35, %v1536_v10 }
 0x30b   : > { %v1247_v41 = vpop.eup %1246  ;;  %955 = vst [vmem:[%s1728_s17 + $0x58] sm:$0xff] %v939_v13  ;;  %v937_v12 = vmul.f32 %v1245_v36, %v1526_v6 }
 0x30c   : > { %v1249_v42 = vpop.eup %1248  ;;  %952 = vst [vmem:[%s1728_s17 + $0x40] sm:$0xff] %v936_v16  ;;  %v942_v11 = vmul.f32 %v1247_v41, %v1523_v5 }
 0x30d   : > { %953 = vst [vmem:[%s1728_s17 + $0x48] sm:$0xff] %v937_v12  ;;  %v943_v38 = vmul.f32 %v1249_v42, %v1515_v2 }
 0x30e   : > { %958 = vst [vmem:[%s1728_s17 + $0x70] sm:$0xff] %v942_v11 }
 0x30f   : > { %959 = vst [vmem:[%s1728_s17 + $0x78] sm:$0xff] %v943_v38 }
 0x311   : > { %v1251_v7 = vpop.eup %1250 }
 0x312   : > { %v1253_v10 = vpop.eup %1252  ;;  %v940_v56 = vmul.f32 %v1251_v7, %v1518_v3 }
 0x313   : > { %v941_v2 = vmul.f32 %v1253_v10, %v1512_v1 }
 0x314   : > { %956 = vst [vmem:[%s1728_s17 + $0x60] sm:$0xff] %v940_v56 }
 0x315   : > { %957 = vst [vmem:[%s1728_s17 + $0x68] sm:$0xff] %v941_v2 }
 0x316   : > { %1295 = shalt.err (!%p1292_p10)
}
 0x317   : > { %s1296_s20 = scalar_lea.hbm %s1762_s13, 2048  ;;  %s1300_s15 = scalar_lea.hbm %s1816_s6, 4096 }
 0x318   : > { %p1297_p0 = scmp.ne.s32.totalorder %s1762_s13, %s1296_s20  ;;  %p1301_p1 = scmp.lt.s32.totalorder %s1762_s13, %s1816_s6 }
 0x319   : > { %p1302_p3 = scmp.lt.s32.totalorder %s1300_s15, %s1296_s20 }
 0x31a   : > { %p1298_p2 = pnand %p1297_p0, %p1825_p12 }
 0x31b   : > { %p1303_p6 = por %p1302_p3, %p1301_p1 }
 0x31c   : > { %p1299_p9 = pneg %p1298_p2 }
 0x31e   : > { %p1304_p11 = pnand %p1303_p6, %p1299_p9 }
 0x320   : > { %1307 = shalt.err (!%p1304_p11)
}
 0x321   : > { %s1363_s28 = smov 256   ;;  %s1364_s7 = smov 16  }
 0x322   : > { %1123 = dma.vmem_to_hbm [thread:$0]  (%p1825_p12), %s1764_s26, 2048, %s1762_s13, %s961_s25, %s1363_s28, %s1363_s28, %s1364_s7  }
 0x323 PF: > { %s989_s8 = sand.u32 1, %s1334_s21   ;;  %p1826_p13 = scmp.ne.s32.totalorder %s1822_s10, 0 }
 0x324   : > { %p1827_p4 = scmp.ge.s32.totalorder %s1346_s24, 2  ;;  %s990_s16 = scalar_lea.sflag [#allocation4], %s989_s8 }
 0x326   : > { %p1130_p5 = pnand %p1827_p4, %p1826_p13 }
 0x328   : > { %p1131_p7 = pneg %p1130_p5 }
 0x32a   : > { %1329 = dma.done.wait (%p1131_p7), %s990_s16, 2048  }
 0x32b   : > { %1331 = vsyncadd (%p1131_p7), %s990_s16, 4294965248  ;;  %p19_p8 = scmp.ge.s32.totalorder %s1425_s27, 4   ;;  %s1828_s21 = smov %s1338_s22 }
 0x32c   : > { %s1829_s22 = smov %s1342_s23  ;;  %s1830_s23 = smov %s1437_s30 }
 0x32d   : > { %s1831_s24 = smov %s1425_s27  ;;  %21 = sbr.rel (!%p19_p8) target bundleno = 5 (0x5), region = 96 }
 0x332   :  { %995 = vsyncpa [#allocation3], 1 }
 0x333   :  { %997 = vsyncpa [#allocation3 + $0x1], 1 }
 0x334   :  { %998 = vsyncpa [#allocation4], 1 }
 0x335   :  { %1000 = vsyncpa [#allocation4 + $0x1], 1 }

</bundles_post_ra>
